<compile_context>
chip_gen: v6e
topology: v6e:2x2x1
jax: 0.10.0
libtpu: 0.0.40
codegen_flags: <defaults>
</compile_context>

<pallas_src>
import functools

import jax
import jax.numpy as jnp
from jax import lax
from jax.experimental import pallas as pl
from jax.experimental.pallas import tpu as pltpu


# --------------------------------- kernel ------------------------------------


def _resblock_kernel(x_ref, w1_ref, b1_ref, w2_ref, b2_ref, o_ref,
                     *, H, W, Cin, Cout, B):
    """Fused ResBlock forward for a block of B images.

    x_ref  : (B, Cin, H*W)            bf16  channel-major, lane-dense
    w1_ref : (Cout, 9*Cin)            bf16  conv1 weights^T, tap order (kh,kw,ci)
    b1_ref : (Cout, 1)                f32
    w2_ref : (Cout, 9*Cout + Cin)     bf16  conv2 weights^T with shortcut folded
    b2_ref : (Cout, 1)                f32   b2 (+ bs if 1x1 shortcut)
    o_ref  : (B, Cout, H*W)           f32
    """
    HW = H * W
    f32, bf16 = jnp.float32, jnp.bfloat16

    # ---- hoisted loads / constants (shared by every image & both convs) ------
    w1 = w1_ref[...]
    w2 = w2_ref[...]
    b1 = b1_ref[...]
    b2 = b2_ref[...]

    lane = lax.broadcasted_iota(jnp.int32, (1, HW), 1)
    ww = lane % W
    mask_l = (ww >= 1).astype(bf16)        # horizontal tap kw=0 (left neighbour)
    mask_r = (ww <= W - 2).astype(bf16)    # horizontal tap kw=2 (right neighbour)
    wmask = {0: mask_l, 1: None, 2: mask_r}

    pad = W + 1                            # covers the largest tap offset +-(W+1)

    def conv_cols(src, c):
        """Build col^T (9*c, HW) for a 3x3 / pad=1 conv from (c, HW) input.

        Vertical out-of-range reads fall into the zero extension; horizontal
        row-boundary reads are zeroed by the two hoisted masks.  Every tap is a
        static, contiguous lane slice -- no strided relayouts, no scatter.
        """
        zeros = jnp.zeros((c, pad), bf16)
        ext = jnp.concatenate([zeros, src, zeros], axis=1)   # (c, HW + 2W + 2)
        taps = []
        for kh in range(3):
            for kw in range(3):
                start = pad + (kh - 1) * W + (kw - 1)
                t = ext[:, start:start + HW]
                m = wmask[kw]
                if m is not None:
                    t = t * m
                taps.append(t)
        return jnp.concatenate(taps, axis=0)                 # (9*c, HW)

    for b in range(B):
        x = x_ref[b]                                         # (Cin, HW) bf16

        # conv1 + relu : single MXU dot, (Cout, HW) lane-dense result
        h1 = jnp.dot(w1, conv_cols(x, Cin), preferred_element_type=f32) + b1
        h1 = jnp.maximum(h1, 0.0).astype(bf16)

        # conv2 with the shortcut folded into the same dot (K = 9*Cout + Cin)
        col2 = jnp.concatenate([conv_cols(h1, Cout), x], axis=0)
        h2 = jnp.dot(w2, col2, preferred_element_type=f32) + b2

        o_ref[b] = jnp.maximum(h2, 0.0)                      # dense f32 store


# --------------------------------- wrapper -----------------------------------


def res_block(x_nchw, params, *, block_batch=None):
    """Forward pass matching the PyTorch ResBlock. Input/output NCHW float32."""
    N, Cin, H, W = x_nchw.shape
    Cout = params["w1"].shape[-1]
    HW = H * W
    has_shortcut = Cin != Cout

    # NCHW -> channel-major lane-dense slab (free reshape; no transpose).
    x_slab = x_nchw.reshape(N, Cin, HW).astype(jnp.bfloat16)

    # Conv weights: HWIO -> (Cout, 9*C), tap order (kh, kw, ci).
    w1t = (jnp.transpose(params["w1"], (3, 0, 1, 2))
           .reshape(Cout, 9 * Cin).astype(jnp.bfloat16))
    w2t = (jnp.transpose(params["w2"], (3, 0, 1, 2))
           .reshape(Cout, 9 * Cout).astype(jnp.bfloat16))

    # Fold the shortcut (1x1 conv, or identity) into conv2's matmul.
    if has_shortcut:
        wst = jnp.transpose(params["ws"], (1, 0)).astype(jnp.bfloat16)  # (Cout,Cin)
        b2eff = (params["b2"] + params["bs"]).reshape(Cout, 1).astype(jnp.float32)
    else:
        wst = jnp.eye(Cout, dtype=jnp.bfloat16)
        b2eff = params["b2"].reshape(Cout, 1).astype(jnp.float32)
    w2cat = jnp.concatenate([w2t, wst], axis=1)              # (Cout, 9*Cout + Cin)
    b1 = params["b1"].reshape(Cout, 1).astype(jnp.float32)

    # Batch blocking: amortize per-step overhead while keeping >= 2 grid steps
    # (v7x has 2 TensorCores; a length-1 grid would idle one of them).
    if block_batch is None:
        block_batch = 1
        for bb in (8, 4, 2):
            if N % bb == 0 and N // bb >= 2:
                block_batch = bb
                break
    assert N % block_batch == 0
    grid = (N // block_batch,)

    # VMEM budget (double-buffered I/O blocks + weights + live temporaries),
    # with headroom; sized from arithmetic rather than a fixed constant.
    io_bytes = 2 * (block_batch * Cin * HW * 2 + block_batch * Cout * HW * 4)
    w_bytes = (w1t.size + w2cat.size) * 2 + (b1.size + b2eff.size) * 4
    tmp_bytes = block_batch * ((10 * Cin + 10 * Cout) * HW * 2 + 2 * Cout * HW * 4)
    vmem_limit = int(min(100 * 2**20, max(4 * 2**20, 2 * (io_bytes + w_bytes + tmp_bytes))))

    flops = N * 2 * HW * Cout * (9 * Cin + 9 * Cout + Cin)
    bytes_accessed = int(N * Cin * HW * 2 + N * Cout * HW * 4
                         + w1t.size * 2 + w2cat.size * 2
                         + (b1.size + b2eff.size) * 4)

    kernel = functools.partial(_resblock_kernel, H=H, W=W, Cin=Cin, Cout=Cout,
                               B=block_batch)

    out_slab = pl.pallas_call(
        kernel,
        out_shape=jax.ShapeDtypeStruct((N, Cout, HW), jnp.float32),
        grid=grid,
        in_specs=[
            pl.BlockSpec((block_batch, Cin, HW), lambda n: (n, 0, 0)),
            pl.BlockSpec((Cout, 9 * Cin), lambda n: (0, 0)),
            pl.BlockSpec((Cout, 1), lambda n: (0, 0)),
            pl.BlockSpec((Cout, 9 * Cout + Cin), lambda n: (0, 0)),
            pl.BlockSpec((Cout, 1), lambda n: (0, 0)),
        ],
        out_specs=pl.BlockSpec((block_batch, Cout, HW), lambda n: (n, 0, 0)),
        compiler_params=pltpu.CompilerParams(
            dimension_semantics=("parallel",),
            vmem_limit_bytes=vmem_limit),
        cost_estimate=pl.CostEstimate(flops=int(flops), transcendentals=0,
                                      bytes_accessed=bytes_accessed),
    )(x_slab, w1t, b1, w2cat, b2eff)

    # channel-major slab -> NCHW (free reshape).
    return out_slab.reshape(N, Cout, H, W)


# ----------------------------- params & reference -----------------------------


def init_resblock_params(key, in_channels, out_channels):
    """Deterministic synthetic params. Conv weights stored HWIO."""
    ks = jax.random.split(key, 6)
    s1 = 1.0 / jnp.sqrt(in_channels * 9.0)
    s2 = 1.0 / jnp.sqrt(out_channels * 9.0)
    ss = 1.0 / jnp.sqrt(float(in_channels))
    p = {
        "w1": jax.random.uniform(ks[0], (3, 3, in_channels, out_channels),
                                 jnp.float32, -s1, s1),
        "b1": jax.random.uniform(ks[1], (1, out_channels), jnp.float32, -s1, s1),
        "w2": jax.random.uniform(ks[2], (3, 3, out_channels, out_channels),
                                 jnp.float32, -s2, s2),
        "b2": jax.random.uniform(ks[3], (1, out_channels), jnp.float32, -s2, s2),
    }
    if in_channels != out_channels:
        p["ws"] = jax.random.uniform(ks[4], (in_channels, out_channels),
                                     jnp.float32, -ss, ss)
        p["bs"] = jax.random.uniform(ks[5], (1, out_channels), jnp.float32,
                                     -ss, ss)
    return p


def res_block_ref(x_nchw, params):
    """Pure-JAX reference mirroring the kernel's bf16-operand / f32-accum math."""
    f32 = jnp.float32
    rb = lambda a: a.astype(jnp.bfloat16).astype(f32)   # round to bf16

    def conv2d(x, w_hwio, b, pad):
        w_oihw = jnp.transpose(rb(w_hwio), (3, 2, 0, 1))
        y = lax.conv_general_dilated(
            x, w_oihw, (1, 1), [(pad, pad), (pad, pad)],
            dimension_numbers=("NCHW", "OIHW", "NCHW"))
        return y + b.reshape(1, -1, 1, 1)

    cin = x_nchw.shape[1]
    cout = params["w1"].shape[-1]
    x = rb(x_nchw)
    if cin != cout:
        ws_oihw = jnp.transpose(rb(params["ws"]), (1, 0))[:, :, None, None]
        residual = lax.conv_general_dilated(
            x, ws_oihw, (1, 1), [(0, 0), (0, 0)],
            dimension_numbers=("NCHW", "OIHW", "NCHW"))
        residual = residual + params["bs"].reshape(1, -1, 1, 1)
    else:
        residual = x
    out = jax.nn.relu(conv2d(x, params["w1"], params["b1"], 1))
    out = conv2d(rb(out), params["w2"], params["b2"], 1)
    return jax.nn.relu(out + residual)


# ----------------------------------- main --------------------------------------

if __name__ == "__main__":
    H, W = 16, 16
    key = jax.random.PRNGKey(0)
    kx, kp1, kp2 = jax.random.split(key, 3)

    # case 1: Cin != Cout -> 1x1 conv shortcut (folded into conv2's matmul)
    N, Cin, Cout = 2, 4, 8
    x = jax.random.normal(kx, (N, Cin, H, W), jnp.float32)
    params = init_resblock_params(kp1, Cin, Cout)
    out = jax.block_until_ready(res_block(x, params))
    ref = jax.block_until_ready(res_block_ref(x, params))
    assert out.shape == (N, Cout, H, W), out.shape
    err = float(jnp.max(jnp.abs(out - ref)))
    assert err < 1e-2, f"max|diff| = {err}"

    # case 2: Cin == Cout -> identity shortcut (folded as an identity block)
    x2 = jax.random.normal(kx, (N, Cout, H, W), jnp.float32)
    params2 = init_resblock_params(kp2, Cout, Cout)
    out2 = jax.block_until_ready(res_block(x2, params2))
    ref2 = jax.block_until_ready(res_block_ref(x2, params2))
    assert out2.shape == (N, Cout, H, W), out2.shape
    err2 = float(jnp.max(jnp.abs(out2 - ref2)))
    assert err2 < 1e-2, f"max|diff| = {err2}"

    print("KERNEL_OK")
</pallas_src>

<mosaic_0001>
module attributes {stable_mosaic.version = 11 : i64} {
  func.func @_resblock_kernel(%arg0: i32, %arg1: memref<1x4x256xbf16, #tpu.memory_space<vmem>>, %arg2: memref<8x36xbf16, #tpu.memory_space<vmem>>, %arg3: memref<8x1xf32, #tpu.memory_space<vmem>>, %arg4: memref<8x76xbf16, #tpu.memory_space<vmem>>, %arg5: memref<8x1xf32, #tpu.memory_space<vmem>>, %arg6: memref<1x8x256xf32, #tpu.memory_space<vmem>>) attributes {dimension_semantics = [#tpu.dimension_semantics<parallel>], iteration_bounds = array<i64: 2>, scalar_prefetch = 0 : i64, scratch_operands = 0 : i64, tpu.core_type = #tpu.core_type<tc>, window_params = [{transform_indices = @transform_0, window_bounds = array<i64: 1, 4, 256>}, {pipeline_mode = #tpu.pipeline_mode<synchronous>, transform_indices = @transform_1, window_bounds = array<i64: 8, 36>}, {pipeline_mode = #tpu.pipeline_mode<synchronous>, transform_indices = @transform_2, window_bounds = array<i64: 8, 1>}, {pipeline_mode = #tpu.pipeline_mode<synchronous>, transform_indices = @transform_3, window_bounds = array<i64: 8, 76>}, {pipeline_mode = #tpu.pipeline_mode<synchronous>, transform_indices = @transform_4, window_bounds = array<i64: 8, 1>}, {transform_indices = @transform_5, window_bounds = array<i64: 1, 8, 256>}]} {
    %c0 = arith.constant 0 : index
    %c0_0 = arith.constant 0 : index
    %0 = vector.load %arg2[%c0, %c0_0] : memref<8x36xbf16, #tpu.memory_space<vmem>>, vector<8x36xbf16>
    %c0_1 = arith.constant 0 : index
    %c0_2 = arith.constant 0 : index
    %1 = vector.load %arg4[%c0_1, %c0_2] : memref<8x76xbf16, #tpu.memory_space<vmem>>, vector<8x76xbf16>
    %c0_3 = arith.constant 0 : index
    %c0_4 = arith.constant 0 : index
    %2 = vector.load %arg3[%c0_3, %c0_4] : memref<8x1xf32, #tpu.memory_space<vmem>>, vector<8x1xf32>
    %c0_5 = arith.constant 0 : index
    %c0_6 = arith.constant 0 : index
    %3 = vector.load %arg5[%c0_5, %c0_6] : memref<8x1xf32, #tpu.memory_space<vmem>>, vector<8x1xf32>
    %4 = tpu.iota {dimensions = array<i32: 1>} : vector<1x256xi32>
    %c16_i32 = arith.constant 16 : i32
    %c0_i32 = arith.constant 0 : i32
    %5 = arith.cmpi eq, %c16_i32, %c0_i32 : i32
    %c1_i32 = arith.constant 1 : i32
    %6 = arith.select %5, %c1_i32, %c16_i32 : i32
    %7 = vector.broadcast %6 : i32 to vector<1x256xi32>
    %8 = arith.remsi %4, %7 : vector<1x256xi32>
    %c0_i32_7 = arith.constant 0 : i32
    %9 = vector.broadcast %c0_i32_7 : i32 to vector<1x256xi32>
    %10 = arith.cmpi ne, %8, %9 : vector<1x256xi32>
    %c0_i32_8 = arith.constant 0 : i32
    %11 = vector.broadcast %c0_i32_8 : i32 to vector<1x256xi32>
    %12 = arith.cmpi slt, %8, %11 : vector<1x256xi32>
    %c0_i32_9 = arith.constant 0 : i32
    %13 = arith.cmpi slt, %6, %c0_i32_9 : i32
    %14 = vector.broadcast %13 : i1 to vector<1x256xi1>
    %15 = vector.broadcast %14 : vector<1x256xi1> to vector<1x256xi1>
    %16 = arith.xori %12, %15 : vector<1x256xi1>
    %17 = arith.andi %16, %10 : vector<1x256xi1>
    %18 = vector.broadcast %6 : i32 to vector<1x256xi32>
    %19 = arith.addi %8, %18 : vector<1x256xi32>
    %20 = arith.select %17, %19, %8 : vector<1x256xi1>, vector<1x256xi32>
    %c1_i32_10 = arith.constant 1 : i32
    %21 = vector.broadcast %c1_i32_10 : i32 to vector<1x256xi32>
    %22 = arith.cmpi sge, %20, %21 : vector<1x256xi32>
    %23 = arith.extui %22 : vector<1x256xi1> to vector<1x256xi32>
    %24 = arith.sitofp %23 : vector<1x256xi32> to vector<1x256xf32>
    %25 = arith.truncf %24 : vector<1x256xf32> to vector<1x256xbf16>
    %c14_i32 = arith.constant 14 : i32
    %26 = vector.broadcast %c14_i32 : i32 to vector<1x256xi32>
    %27 = arith.cmpi sle, %20, %26 : vector<1x256xi32>
    %28 = arith.extui %27 : vector<1x256xi1> to vector<1x256xi32>
    %29 = arith.sitofp %28 : vector<1x256xi32> to vector<1x256xf32>
    %30 = arith.truncf %29 : vector<1x256xf32> to vector<1x256xbf16>
    %c0_11 = arith.constant 0 : index
    %c0_12 = arith.constant 0 : index
    %c0_13 = arith.constant 0 : index
    %31 = vector.load %arg1[%c0_11, %c0_12, %c0_13] : memref<1x4x256xbf16, #tpu.memory_space<vmem>>, vector<1x4x256xbf16>
    %32 = vector.shape_cast %31 : vector<1x4x256xbf16> to vector<4x256xbf16>
    %cst = arith.constant 0.000000e+00 : bf16
    %33 = vector.broadcast %cst : bf16 to vector<4x17xbf16>
    %34 = tpu.concatenate %33, %32, %33 in 1 : vector<4x17xbf16>, vector<4x256xbf16>, vector<4x17xbf16> -> vector<4x290xbf16>
    %35 = vector.extract_strided_slice %34 {offsets = [0, 0], sizes = [4, 256], strides = [1, 1]} : vector<4x290xbf16> to vector<4x256xbf16>
    %36 = vector.broadcast %25 : vector<1x256xbf16> to vector<4x256xbf16>
    %37 = arith.mulf %35, %36 : vector<4x256xbf16>
    %38 = vector.extract_strided_slice %34 {offsets = [0, 1], sizes = [4, 256], strides = [1, 1]} : vector<4x290xbf16> to vector<4x256xbf16>
    %39 = vector.extract_strided_slice %34 {offsets = [0, 2], sizes = [4, 256], strides = [1, 1]} : vector<4x290xbf16> to vector<4x256xbf16>
    %40 = vector.broadcast %30 : vector<1x256xbf16> to vector<4x256xbf16>
    %41 = arith.mulf %39, %40 : vector<4x256xbf16>
    %42 = vector.extract_strided_slice %34 {offsets = [0, 16], sizes = [4, 256], strides = [1, 1]} : vector<4x290xbf16> to vector<4x256xbf16>
    %43 = vector.broadcast %25 : vector<1x256xbf16> to vector<4x256xbf16>
    %44 = arith.mulf %42, %43 : vector<4x256xbf16>
    %45 = vector.extract_strided_slice %34 {offsets = [0, 17], sizes = [4, 256], strides = [1, 1]} : vector<4x290xbf16> to vector<4x256xbf16>
    %46 = vector.extract_strided_slice %34 {offsets = [0, 18], sizes = [4, 256], strides = [1, 1]} : vector<4x290xbf16> to vector<4x256xbf16>
    %47 = vector.broadcast %30 : vector<1x256xbf16> to vector<4x256xbf16>
    %48 = arith.mulf %46, %47 : vector<4x256xbf16>
    %49 = vector.extract_strided_slice %34 {offsets = [0, 32], sizes = [4, 256], strides = [1, 1]} : vector<4x290xbf16> to vector<4x256xbf16>
    %50 = vector.broadcast %25 : vector<1x256xbf16> to vector<4x256xbf16>
    %51 = arith.mulf %49, %50 : vector<4x256xbf16>
    %52 = vector.extract_strided_slice %34 {offsets = [0, 33], sizes = [4, 256], strides = [1, 1]} : vector<4x290xbf16> to vector<4x256xbf16>
    %53 = vector.extract_strided_slice %34 {offsets = [0, 34], sizes = [4, 256], strides = [1, 1]} : vector<4x290xbf16> to vector<4x256xbf16>
    %54 = vector.broadcast %30 : vector<1x256xbf16> to vector<4x256xbf16>
    %55 = arith.mulf %53, %54 : vector<4x256xbf16>
    %56 = tpu.concatenate %37, %38, %41, %44, %45, %48, %51, %52, %55 in 0 : vector<4x256xbf16>, vector<4x256xbf16>, vector<4x256xbf16>, vector<4x256xbf16>, vector<4x256xbf16>, vector<4x256xbf16>, vector<4x256xbf16>, vector<4x256xbf16>, vector<4x256xbf16> -> vector<36x256xbf16>
    %cst_14 = arith.constant dense<0.000000e+00> : vector<8x256xf32>
    %57 = tpu.matmul %0, %56, %cst_14 {dimension_numbers = #tpu.dot_dimension_numbers<[1], [0], [0], [1], [0, 0, 1, 1], [], []>} : vector<8x36xbf16>, vector<36x256xbf16>, vector<8x256xf32> -> vector<8x256xf32>
    %58 = vector.broadcast %2 : vector<8x1xf32> to vector<8x256xf32>
    %59 = arith.addf %57, %58 : vector<8x256xf32>
    %cst_15 = arith.constant 0.000000e+00 : f32
    %60 = vector.broadcast %cst_15 : f32 to vector<8x256xf32>
    %61 = arith.maximumf %59, %60 : vector<8x256xf32>
    %62 = arith.truncf %61 : vector<8x256xf32> to vector<8x256xbf16>
    %cst_16 = arith.constant 0.000000e+00 : bf16
    %63 = vector.broadcast %cst_16 : bf16 to vector<8x17xbf16>
    %64 = tpu.concatenate %63, %62, %63 in 1 : vector<8x17xbf16>, vector<8x256xbf16>, vector<8x17xbf16> -> vector<8x290xbf16>
    %65 = vector.extract_strided_slice %64 {offsets = [0, 0], sizes = [8, 256], strides = [1, 1]} : vector<8x290xbf16> to vector<8x256xbf16>
    %66 = vector.broadcast %25 : vector<1x256xbf16> to vector<8x256xbf16>
    %67 = arith.mulf %65, %66 : vector<8x256xbf16>
    %68 = vector.extract_strided_slice %64 {offsets = [0, 1], sizes = [8, 256], strides = [1, 1]} : vector<8x290xbf16> to vector<8x256xbf16>
    %69 = vector.extract_strided_slice %64 {offsets = [0, 2], sizes = [8, 256], strides = [1, 1]} : vector<8x290xbf16> to vector<8x256xbf16>
    %70 = vector.broadcast %30 : vector<1x256xbf16> to vector<8x256xbf16>
    %71 = arith.mulf %69, %70 : vector<8x256xbf16>
    %72 = vector.extract_strided_slice %64 {offsets = [0, 16], sizes = [8, 256], strides = [1, 1]} : vector<8x290xbf16> to vector<8x256xbf16>
    %73 = vector.broadcast %25 : vector<1x256xbf16> to vector<8x256xbf16>
    %74 = arith.mulf %72, %73 : vector<8x256xbf16>
    %75 = vector.extract_strided_slice %64 {offsets = [0, 17], sizes = [8, 256], strides = [1, 1]} : vector<8x290xbf16> to vector<8x256xbf16>
    %76 = vector.extract_strided_slice %64 {offsets = [0, 18], sizes = [8, 256], strides = [1, 1]} : vector<8x290xbf16> to vector<8x256xbf16>
    %77 = vector.broadcast %30 : vector<1x256xbf16> to vector<8x256xbf16>
    %78 = arith.mulf %76, %77 : vector<8x256xbf16>
    %79 = vector.extract_strided_slice %64 {offsets = [0, 32], sizes = [8, 256], strides = [1, 1]} : vector<8x290xbf16> to vector<8x256xbf16>
    %80 = vector.broadcast %25 : vector<1x256xbf16> to vector<8x256xbf16>
    %81 = arith.mulf %79, %80 : vector<8x256xbf16>
    %82 = vector.extract_strided_slice %64 {offsets = [0, 33], sizes = [8, 256], strides = [1, 1]} : vector<8x290xbf16> to vector<8x256xbf16>
    %83 = vector.extract_strided_slice %64 {offsets = [0, 34], sizes = [8, 256], strides = [1, 1]} : vector<8x290xbf16> to vector<8x256xbf16>
    %84 = vector.broadcast %30 : vector<1x256xbf16> to vector<8x256xbf16>
    %85 = arith.mulf %83, %84 : vector<8x256xbf16>
    %86 = tpu.concatenate %67, %68, %71, %74, %75, %78, %81, %82, %85 in 0 : vector<8x256xbf16>, vector<8x256xbf16>, vector<8x256xbf16>, vector<8x256xbf16>, vector<8x256xbf16>, vector<8x256xbf16>, vector<8x256xbf16>, vector<8x256xbf16>, vector<8x256xbf16> -> vector<72x256xbf16>
    %87 = tpu.concatenate %86, %32 in 0 : vector<72x256xbf16>, vector<4x256xbf16> -> vector<76x256xbf16>
    %cst_17 = arith.constant dense<0.000000e+00> : vector<8x256xf32>
    %88 = tpu.matmul %1, %87, %cst_17 {dimension_numbers = #tpu.dot_dimension_numbers<[1], [0], [0], [1], [0, 0, 1, 1], [], []>} : vector<8x76xbf16>, vector<76x256xbf16>, vector<8x256xf32> -> vector<8x256xf32>
    %89 = vector.broadcast %3 : vector<8x1xf32> to vector<8x256xf32>
    %90 = arith.addf %88, %89 : vector<8x256xf32>
    %cst_18 = arith.constant 0.000000e+00 : f32
    %91 = vector.broadcast %cst_18 : f32 to vector<8x256xf32>
    %92 = arith.maximumf %90, %91 : vector<8x256xf32>
    %c0_19 = arith.constant 0 : index
    %c0_20 = arith.constant 0 : index
    %c0_21 = arith.constant 0 : index
    %93 = vector.load %arg6[%c0_19, %c0_20, %c0_21] : memref<1x8x256xf32, #tpu.memory_space<vmem>>, vector<1x8x256xf32>
    %94 = vector.shape_cast %93 : vector<1x8x256xf32> to vector<8x256xf32>
    %95 = vector.shape_cast %92 : vector<8x256xf32> to vector<1x8x256xf32>
    tpu.vector_store %arg6[%c0_19, %c0_20, %c0_21], %95 {strides = array<i32>} : memref<1x8x256xf32, #tpu.memory_space<vmem>>, vector<1x8x256xf32>,
    return
  }
  func.func @transform_0(%arg0: i32) -> (i32, i32, i32) {
    %c0_i32 = arith.constant 0 : i32
    %c0_i32_0 = arith.constant 0 : i32
    %c0_i32_1 = arith.constant 0 : i32
    return %arg0, %c0_i32, %c0_i32_0 : i32, i32, i32
  }
  func.func @transform_1(%arg0: i32) -> (i32, i32) {
    %c0_i32 = arith.constant 0 : i32
    %c0_i32_0 = arith.constant 0 : i32
    %c0_i32_1 = arith.constant 0 : i32
    return %c0_i32, %c0_i32_0 : i32, i32
  }
  func.func @transform_2(%arg0: i32) -> (i32, i32) {
    %c0_i32 = arith.constant 0 : i32
    %c0_i32_0 = arith.constant 0 : i32
    %c0_i32_1 = arith.constant 0 : i32
    return %c0_i32, %c0_i32_0 : i32, i32
  }
  func.func @transform_3(%arg0: i32) -> (i32, i32) {
    %c0_i32 = arith.constant 0 : i32
    %c0_i32_0 = arith.constant 0 : i32
    %c0_i32_1 = arith.constant 0 : i32
    return %c0_i32, %c0_i32_0 : i32, i32
  }
  func.func @transform_4(%arg0: i32) -> (i32, i32) {
    %c0_i32 = arith.constant 0 : i32
    %c0_i32_0 = arith.constant 0 : i32
    %c0_i32_1 = arith.constant 0 : i32
    return %c0_i32, %c0_i32_0 : i32, i32
  }
  func.func @transform_5(%arg0: i32) -> (i32, i32, i32) {
    %c0_i32 = arith.constant 0 : i32
    %c0_i32_0 = arith.constant 0 : i32
    %c0_i32_1 = arith.constant 0 : i32
    return %arg0, %c0_i32, %c0_i32_0 : i32, i32, i32
  }
}

</mosaic_0001>

<bundles_post_ra>
// kernel: tpu_custom_call.1
= control target key start
LH: loop header
LB: loop body
LE: loop exit
PB: predicated region body
PF: predicated region fallthrough
CT: control target
= control target key end

     0   :  { %10 = vsyncpa [#allocation3], 0  ;;  %s1407_s0 = inlined_call_operand.vmem [shape: bf16[2,4,256], index: 0, kind: input, shape index: {}]   ;;  %s1408_s1 = inlined_call_operand.vmem [shape: bf16[8,36], index: 1, kind: input, shape index: {}]   ;;  %s1409_s2 = inlined_call_operand.vmem [shape: f32[8,1], index: 2, kind: input, shape index: {}]   ;;  %s1410_s3 = inlined_call_operand.vmem [shape: bf16[8,76], index: 3, kind: input, shape index: {}]   ;;  %s1411_s4 = inlined_call_operand.vmem [shape: f32[8,1], index: 4, kind: input, shape index: {}]   ;;  %s1412_s5 = inlined_call_operand.hbm [shape: f32[2,8,256], index: 5, kind: output, shape index: {}]  }
   0x1   :  { %12 = vsyncpa [#allocation3 + $0x1], 0  ;;  %s1044_s18 = smov 0   ;;  %s1046_s19 = smov 0  }
   0x2   :  { %s1048_s20 = smov 0   ;;  %s1050_s21 = smov 0  }
   0x3 LB: > { %s1065_s22 = sadd.s32 4294967295, %s995_s21   ;;  %s856_s23 = sadd.s32 4294967294, %s995_s21   ;;  %s995_s21 = sphi %s1050_s21, %s1418_s21   ;;  %s991_s20 = sphi %s1048_s20, %s1417_s20   ;;  %s987_s19 = sphi %s1046_s19, %s1416_s19   ;;  %s983_s18 = sphi %s1044_s18, %s1415_s18  }
   0x4   : > { %s1069_s24 = sadd.s32 1, %s995_s21   ;;  %s135_s25 = sadd.s32 1, %s991_s20 }
   0x5   : > { %s132_s26 = ssub.s32 %s995_s21, %s1069_s24  ;;  %p145_p0 = scmp.ne.s32.totalorder %s991_s20, %s987_s19 }
   0x6   : > { %p133_p1 = scmp.eq.s32.totalorder %s132_s26, 0  ;;  %p146_p2 = scmp.eq.s32.totalorder %s1065_s22, 1 }
   0x7   : > { %p151_p3 = scmp.ne.s32.totalorder %s987_s19, %s983_s18  ;;  %p152_p4 = scmp.eq.s32.totalorder %s856_s23, 1 }
   0x8   : > { %s1080_s27 = scalar_select %p133_p1, %s991_s20, %s135_s25  }
   0x9   : > { %p1082_p5 = por %p146_p2, %p145_p0  ;;  %p1086_p6 = por %p152_p4, %p151_p3 }
   0xa   : > { %p859_p7 = scmp.ge.s32.totalorder %s995_s21, 1  ;;  %p190_p8 = scmp.lt.s32.totalorder %s995_s21, 3 }
   0xc   : > { %p191_p9 = pnand %p859_p7, %p190_p8 }
   0xd   : > { %p218_p10 = scmp.lt.s32.totalorder (!%p191_p9), %s1065_s22, 1  ;;  %s997_s10 = smov (!%p191_p9), 17  }
   0xe   : > { %194 = sbr.rel (%p191_p9) target bundleno = 1004 (0x3ec), region = 40  ;;  %s999_s11 = smov (!%p191_p9), 18  }
   0xf   : > { %s1000_s12 = smov (!%p191_p9), 32   ;;  %s1001_s13 = smov (!%p191_p9), 34  }
  0x10   : > { %s1002_s14 = smov (!%p191_p9), 2   ;;  %s1003_s15 = smov (!%p191_p9), 16  }
  0x11   : > { %s1004_s16 = smov (!%p191_p9), 111   ;;  %s1005_s17 = smov (!%p191_p9), 95  }
  0x12   : > { %s1006_s23 = smov (!%p191_p9), 127   ;;  %s1007_s25 = smov (!%p191_p9), 94  }
  0x13   : > { %v228_v0 = vlaneseq  ;;  %s219_s30 = scalar_select %p218_p10, %s1065_s22, 1  ;;  %v998_v6 = vmov 0.0   ;;  %vm285_vm4 = vcmask 138240   ;;  %vm354_vm5 = vcmask 277504  }
  0x14   : > { %vm330_vm6 = vcmask 146432   ;;  %s1008_s26 = smov 96   ;;  %vm342_vm7 = vcmask 261120   ;;  %vm318_vm8 = vcmask 130048   ;;  %vm304_vm9 = vcmask 15360   ;;  %s1011_s7 = smov 112  }
  0x15   : > { %v229_v1 = vand.u32 127, %v228_v0  ;;  %s877_s6 = sshll.u32 %s219_s30, 2  ;;  %s1009_s30 = smov 126   ;;  %vm466_vm10 = vcmask 769024   ;;  %vm469_vm11 = vcmask 1041408   ;;  %vm427_vm12 = vcmask 900096  }
  0x16   : > { %s222_s9 = scalar_lea.vmem %s1407_s0, %s877_s6  ;;  %s1010_s6 = smov 110   ;;  %vm442_vm13 = vcmask 785408   ;;  %vm412_vm14 = vcmask 908288   ;;  %vm476_vm15 = vcmask 1043456  }
  0x17   : > { %v235_v2 = vand.u32 15, %v229_v1  ;;  %v230_v3 = vadd.s32 128, %v229_v1  ;;  %v1097_v4 = vld.sshfl [vmem:[%s222_s9] sm:$0x33 pattern:$0x76325410] }
  0x18   : > { %281 = vrot.lane.b32.xlu0 %v1097_v4, %s997_s10  ;;  %v280_v8 = vcombine.high %v1097_v4, %v1097_v4  ;;  %v1012_v1 = vmov 0  }
  0x19   : > { %vm263_vm0 = vcmp.le.s32.totalorder %v235_v2, 14  ;;  %v242_v5 = vand.u32 15, %v230_v3  ;;  %vm255_vm1 = vcmp.ge.s32.totalorder %v235_v2, 1  ;;  %551 = vmatprep.mubr.bf16.mxu0 %v1012_v1  ;;  %769 = vmatprep.mubr.bf16.mxu1 %v1012_v1 }
  0x1a   : > { %v865_v7 = vsel %vm263_vm0, 1.0, %v998_v6  ;;  %v863_v10 = vsel %vm255_vm1, 1.0, %v998_v6  ;;  %934 = vset.pattern.permute.xlu0 %v1012_v1  ;;  %vm454_vm0 = vcmask 777216   ;;  %vm373_vm1 = vcmask 1039360  }
  0x1b   : > { %v269_v9 = vpack.c.bf16 %v865_v7, %v865_v7  ;;  %vm264_vm2 = vcmp.le.s32.totalorder %v242_v5, 14  ;;  %vm256_vm3 = vcmp.ge.s32.totalorder %v242_v5, 1  ;;  %v1104_v13 = vpack.c.bf16 %v863_v10, %v863_v10  ;;  %v226_v7 = vld [vmem:[%s1409_s2] sm:$0xff] }
  0x1c   : > { %v866_v11 = vsel %vm264_vm2, 1.0, %v998_v6  ;;  %283 = vrot.lane.b32.xlu0 %v280_v8, %s997_s10  ;;  %v864_v14 = vsel %vm256_vm3, 1.0, %v998_v6  ;;  %vm481_vm2 = vcmask 1045504   ;;  %vm388_vm3 = vcmask 1031168  }
  0x1d   : > { %326 = vrot.lane.b32.xlu1 %v269_v9, %s999_s11  ;;  %v270_v12 = vpack.c.bf16 %v866_v11, %v866_v11  ;;  %v1106_v15 = vpack.c.bf16 %v864_v14, %v864_v14 }
  0x20   : > { %338 = vrot.lane.b32.xlu0 %v1104_v13, %s1000_s12 }
  0x21   : > { %328 = vrot.lane.b32.xlu1 %v270_v12, %s999_s11 }
  0x24   : > { %350 = vrot.lane.b32.xlu0 %v269_v9, %s1001_s13 }
  0x25   : > { %340 = vrot.lane.b32.xlu1 %v1106_v15, %s1000_s12 }
  0x28   : > { %300 = vrot.lane.b32.xlu0 %v269_v9, %s1002_s14 }
  0x29   : > { %352 = vrot.lane.b32.xlu1 %v270_v12, %s1001_s13 }
  0x2c   : > { %314 = vrot.lane.b32.xlu0 %v1104_v13, %s1003_s15 }
  0x2d   : > { %302 = vrot.lane.b32.xlu1 %v270_v12, %s1002_s14 }
  0x31   : > { %316 = vrot.lane.b32.xlu1 %v1106_v15, %s1003_s15 }
  0x8a   : > { %v282_v16 = vpop.permute.xlu0 %281 }
  0x8b   : > { %v1113_v17 = vsel %vm285_vm4, 0, %v282_v16 }
  0x8c   : > { %406 = vrot.lane.b32.xlu1 %v1113_v17, %s1004_s16  ;;  %v445_v24 = vrot.slane %v1113_v17, 2  ;;  %v364_v25 = vrot.slane %v1113_v17, 6 }
  0x8e   : > { %v284_v19 = vpop.permute.xlu0 %283 }
  0x8f   : > { %v1117_v18 = vpop.permute.xlu1 %326  ;;  %v1120_v20 = vsel %vm285_vm4, %v282_v16, %v284_v19  ;;  %v1123_v21 = vsel %vm285_vm4, %v284_v19, 0 }
  0x90   : > { %410 = vrot.lane.b32.xlu0 %v1123_v21, %s1004_s16  ;;  %408 = vrot.lane.b32.xlu1 %v1120_v20, %s1004_s16  ;;  %v447_v28 = vrot.slane %v1123_v21, 2  ;;  %v365_v32 = vrot.slane %v1120_v20, 6  ;;  %v446_v33 = vrot.slane %v1120_v20, 2  ;;  %v366_v37 = vrot.slane %v1123_v21, 6 }
  0x91   : > { %v335_v40 = vmul.bf16 %v1117_v18, %v1113_v17 }
  0x92   : > { %v1131_v23 = vpop.permute.xlu0 %338 }
  0x93   : > { %v1129_v22 = vpop.permute.xlu1 %328  ;;  %v347_v31 = vmul.bf16 %v1131_v23, %v1113_v17  ;;  %v418_v48 = vrot.slane %v335_v40, 6 }
  0x94   : > { %448 = vrot.lane.b32.xlu0 %v445_v24, %s1005_s17  ;;  %367 = vrot.lane.b32.xlu1 %v364_v25, %s1006_s23  ;;  %v1171_v41 = vsel %vm330_vm6, %v1117_v18, %v1129_v22  ;;  %v337_v53 = vmul.bf16 %v1129_v22, %v1123_v21  ;;  %vm509_vm6 = vcmask 293888  }
  0x95   : > { %v433_v34 = vrot.slane %v347_v31, 4  ;;  %v336_v45 = vmul.bf16 %v1171_v41, %v1120_v20 }
  0x96   : > { %v1139_v27 = vpop.permute.xlu0 %350  ;;  %v420_v59 = vrot.slane %v337_v53, 6 }
  0x97   : > { %v1137_v26 = vpop.permute.xlu1 %340  ;;  %v359_v29 = vmul.bf16 %v1139_v27, %v1113_v17  ;;  %v419_v51 = vrot.slane %v336_v45, 6 }
  0x98   : > { %452 = vrot.lane.b32.xlu1 %v447_v28, %s1005_s17  ;;  %v1183_v46 = vsel %vm342_vm7, %v1131_v23, %v1137_v26  ;;  %v349_v58 = vmul.bf16 %v1137_v26, %v1123_v21 }
  0x99   : > { %460 = vrot.lane.b32.xlu0 %v359_v29, %s1007_s25  ;;  %v348_v52 = vmul.bf16 %v1183_v46, %v1120_v20 }
  0x9a   : > { %v1175_v43 = vpop.permute.xlu0 %300  ;;  %v435_v63 = vrot.slane %v349_v58, 4 }
  0x9b   : > { %v1145_v30 = vpop.permute.xlu1 %352  ;;  %v309_v47 = vmul.bf16 %v1175_v43, %v1113_v17  ;;  %v434_v56 = vrot.slane %v348_v52, 4 }
  0x9c   : > { %369 = vrot.lane.b32.xlu1 %v365_v32, %s1006_s23  ;;  %v1156_v35 = vsel %vm354_vm5, %v1139_v27, %v1145_v30  ;;  %v361_v42 = vmul.bf16 %v1145_v30, %v1123_v21  ;;  %vm403_vm5 = vcmask 916480  }
  0x9d   : > { %450 = vrot.lane.b32.xlu0 %v446_v33, %s1005_s17  ;;  %v360_v39 = vmul.bf16 %v1156_v35, %v1120_v20  ;;  %v379_v55 = vrot.slane %v309_v47, 4 }
  0x9e   : > { %v1191_v50 = vpop.permute.xlu0 %314 }
  0x9f   : > { %v1158_v36 = vpop.permute.xlu1 %302  ;;  %v323_v61 = vmul.bf16 %v1191_v50, %v1113_v17 }
  0xa0   : > { %436 = vrot.lane.b32.xlu1 %v433_v34, %s1008_s26  ;;  %v311_v38 = vmul.bf16 %v1158_v36, %v1123_v21  ;;  %v1209_v60 = vsel %vm304_vm9, %v1175_v43, %v1158_v36 }
  0xa1   : > { %371 = vrot.lane.b32.xlu0 %v366_v37, %s1006_s23  ;;  %v310_v0 = vmul.bf16 %v1209_v60, %v1120_v20  ;;  %v394_v2 = vrot.slane %v323_v61, 2 }
  0xa2   : > { %v381_v44 = vrot.slane %v311_v38, 4 }
  0xa3   : > { %v1187_v49 = vpop.permute.xlu1 %316  ;;  %v380_v5 = vrot.slane %v310_v0, 4 }
  0xa4   : > { %462 = vrot.lane.b32.xlu1 %v360_v39, %s1007_s25  ;;  %v1199_v54 = vsel %vm318_vm8, %v1191_v50, %v1187_v49  ;;  %v325_v3 = vmul.bf16 %v1187_v49, %v1123_v21 }
  0xa5   : > { %464 = vrot.lane.b32.xlu0 %v361_v42, %s1007_s25  ;;  %v324_v57 = vmul.bf16 %v1199_v54, %v1120_v20 }
  0xa6   : > { %v396_v6 = vrot.slane %v325_v3, 2  ;;  %v296_v3 = vmul.bf16 %v1113_v17, %v1104_v13 }
  0xa7   : > { %v395_v62 = vrot.slane %v324_v57, 2 }
  0xa8   : > { %386 = vrot.lane.b32.xlu1 %v381_v44, %s1009_s30 }
  0xa9   : > { %421 = vrot.lane.b32.xlu0 %v418_v48, %s1010_s6 }
  0xac   : > { %423 = vrot.lane.b32.xlu1 %v419_v51, %s1010_s6 }
  0xad   : > { %382 = vrot.lane.b32.xlu0 %v379_v55, %s1009_s30 }
  0xb0   : > { %438 = vrot.lane.b32.xlu1 %v434_v56, %s1008_s26 }
  0xb1   : > { %425 = vrot.lane.b32.xlu0 %v420_v59, %s1010_s6 }
  0xb4   : > { %399 = vrot.lane.b32.xlu1 %v395_v62, %s1011_s7 }
  0xb5   : > { %440 = vrot.lane.b32.xlu0 %v435_v63, %s1008_s26 }
  0xb8   : > { %397 = vrot.lane.b32.xlu1 %v394_v2, %s1011_s7 }
  0xb9   : > { %384 = vrot.lane.b32.xlu0 %v380_v5, %s1009_s30 }
  0xbd   : > { %401 = vrot.lane.b32.xlu0 %v396_v6, %s1011_s7 }
  0xc1   : > { %506 = vperm.xlu0 %934, %v226_v7   ;;  %v297_v7 = vmul.bf16 %v1120_v20, %v1106_v15 }
  0xfe   : > { %v407_v8 = vpop.permute.xlu1 %406 }
 0x102   : > { %v409_v9 = vpop.permute.xlu1 %408  ;;  %v411_v10 = vpop.permute.xlu0 %410 }
 0x103   : > { %v413_v48 = vsel %vm412_vm14, %v407_v8, %v409_v9  ;;  %v414_v51 = vsel %vm412_vm14, %v409_v9, %v411_v10 }
 0x106   : > { %v368_v11 = vpop.permute.xlu1 %367  ;;  %v449_v12 = vpop.permute.xlu0 %448 }
 0x10a   : > { %v453_v14 = vpop.permute.xlu1 %452 }
 0x10b   : > { %v461_v16 = vpop.permute.xlu0 %460 }
 0x10e   : > { %v370_v19 = vpop.permute.xlu1 %369 }
 0x10f   : > { %v451_v21 = vpop.permute.xlu0 %450  ;;  %v374_v0 = vsel %vm373_vm1, %v368_v11, %v370_v19 }
 0x110   : > { %v456_v59 = vsel %vm454_vm0, %v451_v21, %v453_v14  ;;  %v455_v62 = vsel %vm454_vm0, %v449_v12, %v451_v21  ;;  %v472_v9 = vsel %vm469_vm11, %v296_v3, %v374_v0 }
 0x112   : > { %v437_v24 = vpop.permute.xlu1 %436 }
 0x113   : > { %v372_v25 = vpop.permute.xlu0 %371 }
 0x114   : > { %v375_v5 = vsel %vm373_vm1, %v370_v19, %v372_v25 }
 0x115   : > { %v475_v11 = vsel %vm469_vm11, %v297_v7, %v375_v5 }
 0x116   : > { %v463_v28 = vpop.permute.xlu1 %462 }
 0x117   : > { %v465_v29 = vpop.permute.xlu0 %464  ;;  %v467_v31 = vsel %vm466_vm10, %v461_v16, %v463_v28 }
 0x118   : > { %v468_v32 = vsel %vm466_vm10, %v463_v28, %v465_v29  ;;  %v514_v33 = vsel %vm469_vm11, %v467_v31, 0 }
 0x119   : > { %868 = vmatprep.subr.msk.bf16.mxu0 %vm469_vm11, %v468_v32 }
 0x11a   : > { %v387_v34 = vpop.permute.xlu1 %386  ;;  %530 = vmatpush1.bf16.msra.mxu0 %v514_v33 }
 0x11b   : > { %v422_v37 = vpop.permute.xlu0 %421 }
 0x11e   : > { %v424_v38 = vpop.permute.xlu1 %423 }
 0x11f   : > { %v383_v39 = vpop.permute.xlu0 %382  ;;  %v428_v44 = vsel %vm427_vm12, %v422_v37, %v424_v38 }
 0x120   : > { %v490_v52 = vsel %vm469_vm11, %v413_v48, %v428_v44 }
 0x122   : > { %v439_v40 = vpop.permute.xlu1 %438 }
 0x123   : > { %v426_v42 = vpop.permute.xlu0 %425  ;;  %v443_v45 = vsel %vm442_vm13, %v437_v24, %v439_v40  ;;  %v224_v24 = vld [vmem:[%s1408_s1] sm:$0xf] }
 0x124   : > { %v429_v47 = vsel %vm427_vm12, %v424_v38, %v426_v42  ;;  %v495_v58 = vsel %vm476_vm15, %v490_v52, %v443_v45 }
 0x125   : > { %v493_v55 = vsel %vm469_vm11, %v414_v51, %v429_v47  ;;  %v499_v2 = vsel %vm481_vm2, %v495_v58, %v455_v62 }
 0x126   : > { %v400_v56 = vpop.permute.xlu1 %399 }
 0x127   : > { %v441_v53 = vpop.permute.xlu0 %440 }
 0x128   : > { %v444_v57 = vsel %vm442_vm13, %v439_v40, %v441_v53 }
 0x129   : > { %v497_v61 = vsel %vm476_vm15, %v493_v55, %v444_v57 }
 0x12a   : > { %v502_v63 = vsel %vm481_vm2, %v497_v61, %v456_v59  ;;  %v398_v10 = vpop.permute.xlu1 %397 }
 0x12b   : > { %531 = vmatprep.subr.bf16.mxu0 %v502_v63  ;;  %v385_v1 = vpop.permute.xlu0 %384  ;;  %v404_v19 = vsel %vm403_vm5, %v398_v10, %v400_v56 }
 0x12c   : > { %v389_v6 = vsel %vm388_vm3, %v383_v39, %v385_v1  ;;  %532 = vmatpush1.bf16.msra.mxu0 %v499_v2  ;;  %v390_v8 = vsel %vm388_vm3, %v385_v1, %v387_v34 }
 0x12d   : > { %v478_v14 = vsel %vm476_vm15, %v472_v9, %v389_v6  ;;  %v480_v16 = vsel %vm476_vm15, %v475_v11, %v390_v8  ;;  %v717_v8 = vcombine.low %v1097_v4, %v1097_v4 }
 0x12e   : > { %v483_v20 = vsel %vm481_vm2, %v478_v14, %v404_v19 }
 0x12f   : > { %v402_v12 = vpop.permute.xlu0 %401 }
 0x130   : > { %v405_v17 = vsel %vm403_vm5, %v400_v56, %v402_v12 }
 0x131   : > { %v486_v21 = vsel %vm481_vm2, %v480_v16, %v405_v17 }
 0x132   : > { %533 = vmatprep.subr.bf16.mxu0 %v486_v21 }
 0x133   : > { %534 = vmatpush1.bf16.msra.mxu0 %v483_v20 }
 0x136   : > { %869 = vmatmul.mubr.msk.bf16.vlgmr.msra.gmra.mxu0 %vm509_vm6, %v224_v24 }
 0x13c   : > { %v507_v25 = vpop.permute.xlu0 %506 }
 0x1f6   : > { %v553_v28 = vpop.f32.mrf.mxu0 }
 0x1f7   : > { %v554_v29 = vadd.f32 %v553_v28, %v507_v25 }
 0x1f8   : > { %v555_v31 = vpop.f32.mrf.mxu0 }
 0x1f9   : > { %v560_v32 = vmax.f32 %v554_v29, 0.0  ;;  %v556_v33 = vadd.f32 %v555_v31, %v507_v25 }
 0x1fa   : > { %v557_v34 = vpop.f32.mrf.mxu0 }
 0x1fb   : > { %v562_v37 = vpack.c.bf16 %v560_v32, %v560_v32  ;;  %v561_v38 = vmax.f32 %v556_v33, 0.0 }
 0x1fc   : > { %v558_v39 = vpop.f32.mrf.mxu0 }
 0x1fd   : > { %566 = vrot.lane.b32.xlu1 %v562_v37, %s997_s10  ;;  %v563_v40 = vpack.c.bf16 %v561_v38, %v561_v38 }
 0x201   : > { %568 = vrot.lane.b32.xlu1 %v563_v40, %s997_s10 }
 0x26f   : > { %v567_v42 = vpop.permute.xlu1 %566 }
 0x270   : > { %v1267_v44 = vsel %vm285_vm4, 0, %v567_v42 }
 0x271   : > { %633 = vrot.lane.b32.xlu1 %v1267_v44, %s1004_s16  ;;  %v592_v45 = vmul.bf16 %v1267_v44, %v1139_v27  ;;  %v589_v47 = vmul.bf16 %v1267_v44, %v1131_v23  ;;  %v597_v51 = vrot.slane %v1267_v44, 4  ;;  %v580_v23 = vmul.bf16 %v1267_v44, %v1175_v43 }
 0x273   : > { %677 = vrot.lane.b32.xlu0 %v592_v45, %s1007_s25  ;;  %v569_v48 = vpop.permute.xlu1 %568 }
 0x274   : > { %v1280_v52 = vsel %vm285_vm4, %v567_v42, %v569_v48  ;;  %v576_v27 = vsel %vm285_vm4, %v569_v48, 0  ;;  %vm729_vm4 = vcmask 621568  }
 0x275   : > { %658 = vrot.lane.b32.xlu1 %v589_v47, %s1008_s26  ;;  %v594_v53 = vmul.bf16 %v576_v27, %v1145_v30  ;;  %v593_v55 = vmul.bf16 %v1280_v52, %v1156_v35  ;;  %v591_v56 = vmul.bf16 %v576_v27, %v1137_v26  ;;  %v590_v57 = vmul.bf16 %v1280_v52, %v1183_v46 }
 0x276   : > { %v599_v43 = vrot.slane %v576_v27, 4  ;;  %v586_v30 = vmul.bf16 %v1267_v44, %v1117_v18  ;;  %v598_v58 = vrot.slane %v1280_v52, 4  ;;  %v581_v26 = vmul.bf16 %v1280_v52, %v1209_v60 }
 0x277   : > { %666 = vrot.lane.b32.xlu0 %v597_v51, %s1005_s17  ;;  %v587_v46 = vmul.bf16 %v1280_v52, %v1171_v41  ;;  %v582_v59 = vmul.bf16 %v576_v27, %v1158_v36  ;;  %v583_v18 = vmul.bf16 %v1267_v44, %v1191_v50  ;;  %v584_v62 = vmul.bf16 %v1280_v52, %v1199_v54 }
 0x278   : > { %v644_v35 = vrot.slane %v586_v30, 4  ;;  %v588_v60 = vmul.bf16 %v576_v27, %v1129_v22  ;;  %v585_v0 = vmul.bf16 %v576_v27, %v1187_v49  ;;  %v227_v22 = vld [vmem:[%s1411_s4] sm:$0xff] }
 0x279   : > { %635 = vrot.lane.b32.xlu1 %v1280_v52, %s1004_s16  ;;  %v645_v61 = vrot.slane %v587_v46, 4  ;;  %v622_v63 = vrot.slane %v583_v18, 4  ;;  %v623_v41 = vrot.slane %v584_v62, 4 }
 0x27a   : > { %v646_v36 = vrot.slane %v588_v60, 4  ;;  %v624_v50 = vrot.slane %v585_v0, 4  ;;  %v225_v60 = vld [vmem:[%s1410_s3] sm:$0xf] }
 0x27b   : > { %637 = vrot.lane.b32.xlu0 %v576_v27, %s1004_s16  ;;  %s215_s16 = sand.u32 1, %s987_s19  }
 0x27c   : > { %s783_s8 = scalar_lea.sflag [#allocation3], %s215_s16 }
 0x27d   : > { %611 = vrot.lane.b32.xlu1 %v580_v23, %s1009_s30 }
 0x27f   : > { %681 = vrot.lane.b32.xlu0 %v594_v53, %s1007_s25 }
 0x281   : > { %679 = vrot.lane.b32.xlu1 %v593_v55, %s1007_s25 }
 0x283   : > { %662 = vrot.lane.b32.xlu0 %v591_v56, %s1008_s26 }
 0x285   : > { %660 = vrot.lane.b32.xlu1 %v590_v57, %s1008_s26 }
 0x287   : > { %670 = vrot.lane.b32.xlu0 %v599_v43, %s1005_s17 }
 0x289   : > { %668 = vrot.lane.b32.xlu1 %v598_v58, %s1005_s17  ;;  %s860_s17 = sshll.u32 %s215_s16, 4 }
 0x28a   : > { %s217_s25 = scalar_lea.vmem [#allocation2], %s860_s17 }
 0x28b   : > { %647 = vrot.lane.b32.xlu0 %v644_v35, %s1010_s6  ;;  %s797_s26 = sshll.u32 %s217_s25, 4  ;;  %s798_s26 = int_to_ptr.vmem [resolvable:$true] %s797_s26 }
 0x28c   : > { %s935_s9 = scalar_lea.vmem %s798_s26, 256 }
 0x28d   : > { %613 = vrot.lane.b32.xlu1 %v581_v26, %s1009_s30  ;;  %p936_p11 = scmp.ne.s32.totalorder %s798_s26, %s935_s9 }
 0x28f   : > { %615 = vrot.lane.b32.xlu0 %v582_v59, %s1009_s30  ;;  %v579_v59 = vmul.bf16 %v1280_v52, %v1106_v15  ;;  %p937_p12 = pnand %p936_p11, %p1082_p5 }
 0x291   : > { %649 = vrot.lane.b32.xlu1 %v645_v61, %s1010_s6  ;;  %v578_v61 = vmul.bf16 %v1267_v44, %v1104_v13  ;;  %p938_p13 = pneg %p937_p12 }
 0x293   : > { %625 = vrot.lane.b32.xlu0 %v622_v63, %s1011_s7 }
 0x295   : > { %627 = vrot.lane.b32.xlu1 %v623_v41, %s1011_s7 }
 0x297   : > { %651 = vrot.lane.b32.xlu0 %v646_v36, %s1010_s6 }
 0x299   : > { %602 = vrot.lane.b32.xlu1 %v598_v58, %s1006_s23 }
 0x29b   : > { %629 = vrot.lane.b32.xlu0 %v624_v50, %s1011_s7 }
 0x29d   : > { %600 = vrot.lane.b32.xlu1 %v597_v51, %s1006_s23 }
 0x29f   : > { %604 = vrot.lane.b32.xlu0 %v599_v43, %s1006_s23  ;;  %s878_s23 = sshll.u32 %s1065_s22, 8  ;;  %s1013_s22 = smov [#allocation2]  }
 0x2a0   : > { %s1372_s7 = scalar_lea.hbm %s1412_s5, %s878_s23  ;;  %s939_s11 = sshll.u32 %s1013_s22, 4  ;;  %s940_s11 = int_to_ptr.vmem [resolvable:$false] %s939_s11 }
 0x2a1   : > { %s941_s12 = scalar_lea.vmem %s940_s11, 512  ;;  %p942_p0 = scmp.lt.s32.totalorder %s798_s26, %s940_s11 }
 0x2a2   : > { %p943_p1 = scmp.lt.s32.totalorder %s941_s12, %s935_s9 }
 0x2a3   : > { %726 = vperm.xlu0 %934, %v227_v22  }
 0x2a4   : > { %p944_p2 = por %p943_p1, %p942_p0 }
 0x2a6   : > { %p945_p3 = pnand %p944_p2, %p938_p13 }
 0x2e3   : > { %v634_v54 = vpop.permute.xlu1 %633 }
 0x2e5   : > { %v678_v1 = vpop.permute.xlu0 %677 }
 0x2e7   : > { %v659_v2 = vpop.permute.xlu1 %658 }
 0x2e9   : > { %v667_v49 = vpop.permute.xlu0 %666 }
 0x2eb   : > { %v636_v3 = vpop.permute.xlu1 %635 }
 0x2ec   : > { %v639_v48 = vsel %vm412_vm14, %v634_v54, %v636_v3 }
 0x2ed   : > { %v638_v5 = vpop.permute.xlu0 %637 }
 0x2ee   : > { %v640_v45 = vsel %vm412_vm14, %v636_v3, %v638_v5 }
 0x2ef   : > { %v612_v6 = vpop.permute.xlu1 %611 }
 0x2f1   : > { %v682_v7 = vpop.permute.xlu0 %681 }
 0x2f3   : > { %v680_v9 = vpop.permute.xlu1 %679 }
 0x2f4   : > { %v683_v10 = vsel %vm466_vm10, %v678_v1, %v680_v9  ;;  %v684_v11 = vsel %vm466_vm10, %v680_v9, %v682_v7 }
 0x2f5   : > { %v663_v12 = vpop.permute.xlu0 %662  ;;  %v723_v14 = vsel %vm476_vm15, %v684_v11, %v1097_v4  ;;  %v720_v17 = vsel %vm476_vm15, %v683_v10, %v717_v8 }
 0x2f6   : > { %870 = vmatprep.subr.msk.bf16.mxu1 %vm481_vm2, %v723_v14  ;;  %v733_v16 = vsel %vm481_vm2, %v720_v17, 0 }
 0x2f7   : > { %744 = vmatpush1.bf16.msra.mxu1 %v733_v16  ;;  %v661_v19 = vpop.permute.xlu1 %660 }
 0x2f8   : > { %v664_v24 = vsel %vm442_vm13, %v659_v2, %v661_v19  ;;  %v665_v25 = vsel %vm442_vm13, %v661_v19, %v663_v12 }
 0x2f9   : > { %v671_v21 = vpop.permute.xlu0 %670 }
 0x2fb   : > { %v669_v20 = vpop.permute.xlu1 %668 }
 0x2fc   : > { %v672_v28 = vsel %vm454_vm0, %v667_v49, %v669_v20  ;;  %v673_v29 = vsel %vm454_vm0, %v669_v20, %v671_v21 }
 0x2fd   : > { %v648_v31 = vpop.permute.xlu0 %647  ;;  %v715_v4 = vsel %vm476_vm15, %v665_v25, %v673_v29  ;;  %v711_v32 = vsel %vm476_vm15, %v664_v24, %v672_v28 }
 0x2fe   : > { %745 = vmatprep.subr.bf16.mxu1 %v715_v4 }
 0x2ff   : > { %746 = vmatpush1.bf16.msra.mxu1 %v711_v32  ;;  %v614_v33 = vpop.permute.xlu1 %613 }
 0x300   : > { %v617_v43 = vsel %vm388_vm3, %v612_v6, %v614_v33 }
 0x301   : > { %v616_v34 = vpop.permute.xlu0 %615 }
 0x302   : > { %v618_v56 = vsel %vm388_vm3, %v614_v33, %v616_v34 }
 0x303   : > { %v650_v37 = vpop.permute.xlu1 %649 }
 0x304   : > { %v653_v40 = vsel %vm427_vm12, %v648_v31, %v650_v37 }
 0x305   : > { %v626_v38 = vpop.permute.xlu0 %625  ;;  %v703_v23 = vsel %vm476_vm15, %v639_v48, %v653_v40 }
 0x307   : > { %v628_v39 = vpop.permute.xlu1 %627 }
 0x308   : > { %v631_v53 = vsel %vm403_vm5, %v626_v38, %v628_v39 }
 0x309   : > { %v652_v42 = vpop.permute.xlu0 %651  ;;  %v695_v35 = vsel %vm476_vm15, %v617_v43, %v631_v53 }
 0x30a   : > { %v654_v47 = vsel %vm427_vm12, %v650_v37, %v652_v42 }
 0x30b   : > { %v603_v51 = vpop.permute.xlu1 %602  ;;  %v707_v27 = vsel %vm476_vm15, %v640_v45, %v654_v47 }
 0x30c   : > { %747 = vmatprep.subr.bf16.mxu1 %v707_v27 }
 0x30d   : > { %v630_v55 = vpop.permute.xlu0 %629  ;;  %748 = vmatpush1.bf16.msra.mxu1 %v703_v23 }
 0x30e   : > { %v632_v57 = vsel %vm403_vm5, %v628_v39, %v630_v55 }
 0x30f   : > { %v601_v30 = vpop.permute.xlu1 %600  ;;  %v699_v58 = vsel %vm476_vm15, %v618_v56, %v632_v57 }
 0x310   : > { %749 = vmatprep.subr.bf16.mxu1 %v699_v58  ;;  %v606_v26 = vsel %vm373_vm1, %v601_v30, %v603_v51 }
 0x311   : > { %v605_v46 = vpop.permute.xlu0 %604  ;;  %750 = vmatpush1.bf16.msra.mxu1 %v695_v35  ;;  %v687_v63 = vsel %vm476_vm15, %v578_v61, %v606_v26 }
 0x312   : > { %v607_v18 = vsel %vm373_vm1, %v603_v51, %v605_v46 }
 0x313   : > { %v691_v62 = vsel %vm476_vm15, %v579_v59, %v607_v18 }
 0x314   : > { %751 = vmatprep.subr.bf16.mxu1 %v691_v62 }
 0x315   : > { %752 = vmatpush1.bf16.msra.mxu1 %v687_v63 }
 0x318   : > { %871 = vmatmul.mubr.msk.bf16.vlgmr.msra.gmra.mxu1 %vm729_vm4, %v225_v60 }
 0x31e   : > { %v727_v15 = vpop.permute.xlu0 %726 }
 0x3d8   : > { %v771_v52 = vpop.f32.mrf.mxu1 }
 0x3d9   : > { %v772_v41 = vadd.f32 %v771_v52, %v727_v15 }
 0x3da   : > { %v773_v36 = vpop.f32.mrf.mxu1 }
 0x3db   : > { %v778_v13 = vmax.f32 %v772_v41, 0.0  ;;  %v774_v44 = vadd.f32 %v773_v36, %v727_v15 }
 0x3dc   : > { %v775_v0 = vpop.f32.mrf.mxu1 }
 0x3dd   : > { %780 = vst [vmem:[%s217_s25] sm:$0xff] %v778_v13  ;;  %v779_v50 = vmax.f32 %v774_v44, 0.0 }
 0x3de   : > { %v776_v22 = vpop.f32.mrf.mxu1 }
 0x3df   : > { %781 = vst [vmem:[%s217_s25 + $0x8] sm:$0xff] %v779_v50 }
 0x3e0   : > { %948 = shalt.err (!%p945_p3)
}
 0x3e1   : > { %s949_s10 = scalar_lea.hbm %s1372_s7, 256  ;;  %s953_s15 = scalar_lea.hbm %s1412_s5, 512 }
 0x3e2   : > { %p950_p4 = scmp.ne.s32.totalorder %s1372_s7, %s949_s10  ;;  %p954_p9 = scmp.lt.s32.totalorder %s1372_s7, %s1412_s5 }
 0x3e3   : > { %p955_p10 = scmp.lt.s32.totalorder %s953_s15, %s949_s10 }
 0x3e4   : > { %p951_p7 = pnand %p950_p4, %p1082_p5 }
 0x3e5   : > { %p956_p11 = por %p955_p10, %p954_p9 }
 0x3e6   : > { %p952_p8 = pneg %p951_p7 }
 0x3e8   : > { %p957_p12 = pnand %p956_p11, %p952_p8 }
 0x3ea   : > { %960 = shalt.err (!%p957_p12)
}
 0x3eb   : > { %879 = dma.vmem_to_hbm [thread:$0]  (%p1082_p5), %s798_s26, 256, %s1372_s7, %s783_s8  }
 0x3ec PF: > { %p885_p13 = scmp.ge.s32.totalorder %s995_s21, 2  ;;  %s809_s23 = sand.u32 1, %s983_s18  }
 0x3ed   : > { %s810_s25 = scalar_lea.sflag [#allocation3], %s809_s23 }
 0x3ee   : > { %p882_p0 = pnand %p885_p13, %p1086_p6 }
 0x3f0   : > { %p883_p1 = pneg %p882_p0 }
 0x3f2   : > { %978 = dma.done.wait (%p883_p1), %s810_s25, 256  }
 0x3f3   : > { %980 = vsyncadd (%p883_p1), %s810_s25, 4294967040  ;;  %p15_p2 = scmp.ge.s32.totalorder %s1069_s24, 4   ;;  %s1415_s18 = smov %s987_s19 }
 0x3f4   : > { %s1416_s19 = smov %s991_s20  ;;  %s1417_s20 = smov %s1080_s27 }
 0x3f5   : > { %s1418_s21 = smov %s1069_s24  ;;  %17 = sbr.rel (!%p15_p2) target bundleno = 3 (0x3), region = 75 }
 0x3fa   :  { %815 = vsyncpa [#allocation3], 1 }
 0x3fb   :  { %817 = vsyncpa [#allocation3 + $0x1], 1 }

</bundles_post_ra>
